<compile_context>
chip_gen: v5e
topology: v5e:2x2
jax: 0.10.0
libtpu: 0.0.40
codegen_flags: <defaults>
</compile_context>

<pallas_src>
import functools

import jax
import jax.numpy as jnp
from jax.experimental import pallas as pl
from jax.experimental.pallas import tpu as pltpu


# ----------------------------- kernels --------------------------------------


def _concat_kernel(x1_ref, x2_ref, o_ref):
    """phi_simple(x1, x2) = [x1 ; x2] along channels (per-channel full planes)."""
    nb, c1 = x1_ref.shape[:2]
    c2 = x2_ref.shape[1]
    for i in range(nb):
        for k in range(c1):
            o_ref[i, k] = x1_ref[i, k]
        for k in range(c2):
            o_ref[i, c1 + k] = x2_ref[i, k]


def _lin_cat_kernel(x1_ref, x2_ref, w_ref, b_ref, o_ref):
    """phi_lin_cat(x1, x2) = [r(x1) ; x2]; r = 1x1 conv as SMEM-scalar FMAs."""
    nb, c1 = x1_ref.shape[:2]
    c2 = x2_ref.shape[1]
    cout = w_ref.shape[0]
    for i in range(nb):
        for co in range(cout):
            acc = x1_ref[i, 0] * w_ref[co, 0]          # f32 scalar widens acc
            for k in range(1, c1):
                acc = acc + x1_ref[i, k] * w_ref[co, k]
            acc = acc + b_ref[co]
            o_ref[i, co] = acc.astype(o_ref.dtype)
        for k in range(c2):
            o_ref[i, cout + k] = x2_ref[i, k]


def _cat_lin_kernel(x1_ref, x2_ref, w_ref, b_ref, o_ref):
    """phi_cat_lin(x1, x2) = r([x1 ; x2]) = W1@x1 + W2@x2 + b (no in-kernel cat)."""
    nb, c1 = x1_ref.shape[:2]
    c2 = x2_ref.shape[1]
    cout = w_ref.shape[0]
    for i in range(nb):
        for co in range(cout):
            acc = x1_ref[i, 0] * w_ref[co, 0]
            for k in range(1, c1):
                acc = acc + x1_ref[i, k] * w_ref[co, k]
            for k in range(c2):
                acc = acc + x2_ref[i, k] * w_ref[co, c1 + k]
            acc = acc + b_ref[co]
            o_ref[i, co] = acc.astype(o_ref.dtype)


# --------------------------- tiling heuristics -------------------------------

_S_TARGET = 512           # spatial sublanes per tile (x128 lanes = 64K elem/plane)
_MIN_DIVISOR_TILE = 64    # accept a divisor tile this big rather than padding
_TARGET_STEP_BYTES = 4 << 20   # live bytes per grid step (x2 when double-buffered)
                               # -> ~8 MiB, safe within v7x's smaller VMEM too.


def _round_up(x, m):
    return ((x + m - 1) // m) * m


def _pick_spatial_tile(s_raw):
    """Return (s_tile, s_total). s_tile is a multiple of 8 or == s_total."""
    if s_raw <= _S_TARGET:
        return s_raw, s_raw                      # full-extent block: always legal
    best = 0
    d = 8
    while d <= _S_TARGET:
        if s_raw % d == 0:
            best = d
        d += 8
    if best >= _MIN_DIVISOR_TILE:
        return best, s_raw                       # good divisor -> no pad copy
    # Degenerate divisors only: pad the spatial axis (one extra copy, still far
    # cheaper than running 8-sublane tiles at scale).
    return _S_TARGET, _round_up(s_raw, _S_TARGET)


def _pick_batch_block(n, per_image_bytes, grid_s):
    """Fold several images into one grid step; keep >=2 steps for 2-TC chips."""
    divisors = [d for d in range(1, n + 1) if n % d == 0]
    nb = 1
    for d in divisors:
        if d * per_image_bytes <= _TARGET_STEP_BYTES:
            nb = d
    if n > 1 and grid_s * (n // nb) < 2:
        nb = max(d for d in divisors if d < n)
    return nb


# ------------------------------ parameters -----------------------------------


def init_phi_params(key, img_channels, in_channels, scheme):
    """Mirror the module init: kaiming_normal_ weight, default conv bias.

    Weight layout (C_out, C_in) == PyTorch conv weight (C_out, C_in, 1, 1);
    bias is (C_out,).
    """
    if scheme == "simple":
        return None
    if scheme == "lin_cat":
        cin, cout = img_channels, in_channels
    elif scheme == "cat_lin":
        # TODO(synk): the reference __init__ builds r_prime with
        # in_channels=img_channels, which cannot consume cat([x1, x2]) in the
        # forward; we size the weight to what the forward actually requires
        # (img_channels + in_channels -> in_channels).
        cin, cout = img_channels + in_channels, in_channels
    else:
        raise ValueError("No valid scheme is selected")
    w_key, b_key = jax.random.split(key)
    fan_in = cin  # 1x1 kernel
    w = jax.random.normal(w_key, (cout, cin), jnp.float32) * jnp.sqrt(2.0 / fan_in)
    bound = 1.0 / jnp.sqrt(fan_in)
    b = jax.random.uniform(b_key, (cout,), jnp.float32, -bound, bound)
    return {"w": w, "b": b}


# ------------------------------- wrapper --------------------------------------


@functools.partial(jax.jit, static_argnames=("scheme",))
def phi_scheme(x1, x2, params=None, scheme="simple"):
    """PhiScheme.forward. x1: (N, C_img, H, W), x2: (N, C_in, H, W), NCHW."""
    n, c1, h, w_sp = x1.shape
    c2 = x2.shape[1]
    hw = h * w_sp

    out_dtype = jnp.promote_types(x1.dtype, x2.dtype)
    x1 = x1.astype(out_dtype)
    x2 = x2.astype(out_dtype)

    if scheme == "simple":
        # NOTE: when PhiScheme feeds a following conv, fusing the concat into
        # that kernel (or plain jnp.concatenate) avoids one HBM round trip; the
        # kernel is kept here to match the module boundary.
        kernel, out_c, extra = _concat_kernel, c1 + c2, ()
    elif scheme == "lin_cat":
        w, b = params["w"], params["b"]
        kernel, out_c = _lin_cat_kernel, w.shape[0] + c2
        extra = (w.astype(jnp.float32), b.astype(jnp.float32))
    elif scheme == "cat_lin":
        w, b = params["w"], params["b"]
        kernel, out_c = _cat_lin_kernel, w.shape[0]
        extra = (w.astype(jnp.float32), b.astype(jnp.float32))
    else:
        raise ValueError("No valid scheme is selected")

    s_raw = -(-hw // 128)
    s_tile, s_total = _pick_spatial_tile(s_raw)
    hw_pad = s_total * 128
    grid_s = s_total // s_tile

    itemsize = jnp.dtype(out_dtype).itemsize
    per_image_bytes = (c1 + c2 + out_c) * s_tile * 128 * itemsize
    nb = _pick_batch_block(n, per_image_bytes, grid_s)
    grid = (n // nb, grid_s)

    # Free reshape for 128-aligned (power-of-two) resolutions; one pad copy
    # otherwise (kept lane-dense so no masked stores inside the kernel).
    x1f = x1.reshape(n, c1, hw)
    x2f = x2.reshape(n, c2, hw)
    if hw_pad != hw:
        pad = ((0, 0), (0, 0), (0, hw_pad - hw))
        x1f = jnp.pad(x1f, pad)
        x2f = jnp.pad(x2f, pad)
    x1r = x1f.reshape(n, c1, s_total, 128)
    x2r = x2f.reshape(n, c2, s_total, 128)

    def plane_block(c):
        # Channels lead; spatial fills the (sublane, lane) = (S_tile, 128) plane.
        return pl.BlockSpec((nb, c, s_tile, 128), lambda bi, si: (bi, 0, si, 0))

    smem_spec = pl.BlockSpec(memory_space=pltpu.MemorySpace.SMEM)
    in_specs = [plane_block(c1), plane_block(c2)] + [smem_spec] * len(extra)

    outf = pl.pallas_call(
        kernel,
        out_shape=jax.ShapeDtypeStruct((n, out_c, s_total, 128), out_dtype),
        grid=grid,
        in_specs=in_specs,
        out_specs=plane_block(out_c),
        compiler_params=pltpu.CompilerParams(
            dimension_semantics=("parallel", "parallel")),
    )(x1r, x2r, *extra)

    out = outf.reshape(n, out_c, hw_pad)
    if hw_pad != hw:
        out = out[:, :, :hw]
    return out.reshape(n, out_c, h, w_sp)


# ------------------------- reference (plain JAX) ------------------------------


def _phi_ref(x1, x2, params, scheme):
    if scheme == "simple":
        return jnp.concatenate([x1, x2], axis=1)

    def conv1x1(x, w, b):  # x: NCHW, w: (Cout, Cin), b: (Cout,)
        return jnp.einsum("nchw,oc->nohw", x, w) + b[None, :, None, None]

    if scheme == "lin_cat":
        return jnp.concatenate([conv1x1(x1, params["w"], params["b"]), x2], axis=1)
    if scheme == "cat_lin":
        return conv1x1(jnp.concatenate([x1, x2], axis=1), params["w"], params["b"])
    raise ValueError("No valid scheme is selected")


# ---------------------------------- main --------------------------------------


if __name__ == "__main__":
    key = jax.random.PRNGKey(0)
    k_x1, k_x2, k_p1, k_p2, k_x3, k_x4 = jax.random.split(key, 6)

    N, C_IMG, C_IN, H, W = 2, 3, 4, 16, 16
    x1 = jax.random.normal(k_x1, (N, C_IMG, H, W), jnp.float32)
    x2 = jax.random.normal(k_x2, (N, C_IN, H, W), jnp.float32)

    # simple
    out_simple = phi_scheme(x1, x2, None, scheme="simple")
    jax.block_until_ready(out_simple)
    assert out_simple.shape == (N, C_IMG + C_IN, H, W)
    assert jnp.allclose(out_simple, _phi_ref(x1, x2, None, "simple"), atol=1e-5)

    # lin_cat
    p_lin = init_phi_params(k_p1, C_IMG, C_IN, "lin_cat")
    out_lin = phi_scheme(x1, x2, p_lin, scheme="lin_cat")
    jax.block_until_ready(out_lin)
    assert out_lin.shape == (N, C_IN + C_IN, H, W)
    assert jnp.allclose(out_lin, _phi_ref(x1, x2, p_lin, "lin_cat"), atol=1e-4)

    # cat_lin
    p_cat = init_phi_params(k_p2, C_IMG, C_IN, "cat_lin")
    out_cat = phi_scheme(x1, x2, p_cat, scheme="cat_lin")
    jax.block_until_ready(out_cat)
    assert out_cat.shape == (N, C_IN, H, W)
    assert jnp.allclose(out_cat, _phi_ref(x1, x2, p_cat, "cat_lin"), atol=1e-4)

    # non-128-aligned spatial size exercises the pad path
    x1b = jax.random.normal(k_x3, (N, C_IMG, 20, 20), jnp.float32)
    x2b = jax.random.normal(k_x4, (N, C_IN, 20, 20), jnp.float32)
    out_pad = phi_scheme(x1b, x2b, p_lin, scheme="lin_cat")
    jax.block_until_ready(out_pad)
    assert out_pad.shape == (N, C_IN + C_IN, 20, 20)
    assert jnp.allclose(out_pad, _phi_ref(x1b, x2b, p_lin, "lin_cat"), atol=1e-4)

    print("KERNEL_OK")
</pallas_src>

<mosaic_0001>
module attributes {stable_mosaic.version = 11 : i64} {
  func.func @_concat_kernel(%arg0: i32, %arg1: i32, %arg2: memref<1x3x2x128xf32, #tpu.memory_space<vmem>>, %arg3: memref<1x4x2x128xf32, #tpu.memory_space<vmem>>, %arg4: memref<1x7x2x128xf32, #tpu.memory_space<vmem>>) attributes {dimension_semantics = [#tpu.dimension_semantics<parallel>, #tpu.dimension_semantics<parallel>], iteration_bounds = array<i64: 2, 1>, scalar_prefetch = 0 : i64, scratch_operands = 0 : i64, tpu.core_type = #tpu.core_type<tc>, window_params = [{transform_indices = @transform_0, window_bounds = array<i64: 1, 3, 2, 128>}, {transform_indices = @transform_1, window_bounds = array<i64: 1, 4, 2, 128>}, {transform_indices = @transform_2, window_bounds = array<i64: 1, 7, 2, 128>}]} {
    %c0 = arith.constant 0 : index
    %c0_0 = arith.constant 0 : index
    %c0_1 = arith.constant 0 : index
    %c0_2 = arith.constant 0 : index
    %0 = vector.load %arg2[%c0, %c0_0, %c0_1, %c0_2] : memref<1x3x2x128xf32, #tpu.memory_space<vmem>>, vector<1x1x2x128xf32>
    %1 = vector.shape_cast %0 : vector<1x1x2x128xf32> to vector<2x128xf32>
    %c0_3 = arith.constant 0 : index
    %c0_4 = arith.constant 0 : index
    %c0_5 = arith.constant 0 : index
    %c0_6 = arith.constant 0 : index
    %2 = vector.load %arg4[%c0_3, %c0_4, %c0_5, %c0_6] : memref<1x7x2x128xf32, #tpu.memory_space<vmem>>, vector<1x1x2x128xf32>
    %3 = vector.shape_cast %2 : vector<1x1x2x128xf32> to vector<2x128xf32>
    %4 = vector.shape_cast %1 : vector<2x128xf32> to vector<1x1x2x128xf32>
    tpu.vector_store %arg4[%c0_3, %c0_4, %c0_5, %c0_6], %4 {strides = array<i32>} : memref<1x7x2x128xf32, #tpu.memory_space<vmem>>, vector<1x1x2x128xf32>,
    %c0_7 = arith.constant 0 : index
    %c1 = arith.constant 1 : index
    %c0_8 = arith.constant 0 : index
    %c0_9 = arith.constant 0 : index
    %5 = vector.load %arg2[%c0_7, %c1, %c0_8, %c0_9] : memref<1x3x2x128xf32, #tpu.memory_space<vmem>>, vector<1x1x2x128xf32>
    %6 = vector.shape_cast %5 : vector<1x1x2x128xf32> to vector<2x128xf32>
    %c0_10 = arith.constant 0 : index
    %c1_11 = arith.constant 1 : index
    %c0_12 = arith.constant 0 : index
    %c0_13 = arith.constant 0 : index
    %7 = vector.load %arg4[%c0_10, %c1_11, %c0_12, %c0_13] : memref<1x7x2x128xf32, #tpu.memory_space<vmem>>, vector<1x1x2x128xf32>
    %8 = vector.shape_cast %7 : vector<1x1x2x128xf32> to vector<2x128xf32>
    %9 = vector.shape_cast %6 : vector<2x128xf32> to vector<1x1x2x128xf32>
    tpu.vector_store %arg4[%c0_10, %c1_11, %c0_12, %c0_13], %9 {strides = array<i32>} : memref<1x7x2x128xf32, #tpu.memory_space<vmem>>, vector<1x1x2x128xf32>,
    %c0_14 = arith.constant 0 : index
    %c2 = arith.constant 2 : index
    %c0_15 = arith.constant 0 : index
    %c0_16 = arith.constant 0 : index
    %10 = vector.load %arg2[%c0_14, %c2, %c0_15, %c0_16] : memref<1x3x2x128xf32, #tpu.memory_space<vmem>>, vector<1x1x2x128xf32>
    %11 = vector.shape_cast %10 : vector<1x1x2x128xf32> to vector<2x128xf32>
    %c0_17 = arith.constant 0 : index
    %c2_18 = arith.constant 2 : index
    %c0_19 = arith.constant 0 : index
    %c0_20 = arith.constant 0 : index
    %12 = vector.load %arg4[%c0_17, %c2_18, %c0_19, %c0_20] : memref<1x7x2x128xf32, #tpu.memory_space<vmem>>, vector<1x1x2x128xf32>
    %13 = vector.shape_cast %12 : vector<1x1x2x128xf32> to vector<2x128xf32>
    %14 = vector.shape_cast %11 : vector<2x128xf32> to vector<1x1x2x128xf32>
    tpu.vector_store %arg4[%c0_17, %c2_18, %c0_19, %c0_20], %14 {strides = array<i32>} : memref<1x7x2x128xf32, #tpu.memory_space<vmem>>, vector<1x1x2x128xf32>,
    %c0_21 = arith.constant 0 : index
    %c0_22 = arith.constant 0 : index
    %c0_23 = arith.constant 0 : index
    %c0_24 = arith.constant 0 : index
    %15 = vector.load %arg3[%c0_21, %c0_22, %c0_23, %c0_24] : memref<1x4x2x128xf32, #tpu.memory_space<vmem>>, vector<1x1x2x128xf32>
    %16 = vector.shape_cast %15 : vector<1x1x2x128xf32> to vector<2x128xf32>
    %c0_25 = arith.constant 0 : index
    %c3 = arith.constant 3 : index
    %c0_26 = arith.constant 0 : index
    %c0_27 = arith.constant 0 : index
    %17 = vector.load %arg4[%c0_25, %c3, %c0_26, %c0_27] : memref<1x7x2x128xf32, #tpu.memory_space<vmem>>, vector<1x1x2x128xf32>
    %18 = vector.shape_cast %17 : vector<1x1x2x128xf32> to vector<2x128xf32>
    %19 = vector.shape_cast %16 : vector<2x128xf32> to vector<1x1x2x128xf32>
    tpu.vector_store %arg4[%c0_25, %c3, %c0_26, %c0_27], %19 {strides = array<i32>} : memref<1x7x2x128xf32, #tpu.memory_space<vmem>>, vector<1x1x2x128xf32>,
    %c0_28 = arith.constant 0 : index
    %c1_29 = arith.constant 1 : index
    %c0_30 = arith.constant 0 : index
    %c0_31 = arith.constant 0 : index
    %20 = vector.load %arg3[%c0_28, %c1_29, %c0_30, %c0_31] : memref<1x4x2x128xf32, #tpu.memory_space<vmem>>, vector<1x1x2x128xf32>
    %21 = vector.shape_cast %20 : vector<1x1x2x128xf32> to vector<2x128xf32>
    %c0_32 = arith.constant 0 : index
    %c4 = arith.constant 4 : index
    %c0_33 = arith.constant 0 : index
    %c0_34 = arith.constant 0 : index
    %22 = vector.load %arg4[%c0_32, %c4, %c0_33, %c0_34] : memref<1x7x2x128xf32, #tpu.memory_space<vmem>>, vector<1x1x2x128xf32>
    %23 = vector.shape_cast %22 : vector<1x1x2x128xf32> to vector<2x128xf32>
    %24 = vector.shape_cast %21 : vector<2x128xf32> to vector<1x1x2x128xf32>
    tpu.vector_store %arg4[%c0_32, %c4, %c0_33, %c0_34], %24 {strides = array<i32>} : memref<1x7x2x128xf32, #tpu.memory_space<vmem>>, vector<1x1x2x128xf32>,
    %c0_35 = arith.constant 0 : index
    %c2_36 = arith.constant 2 : index
    %c0_37 = arith.constant 0 : index
    %c0_38 = arith.constant 0 : index
    %25 = vector.load %arg3[%c0_35, %c2_36, %c0_37, %c0_38] : memref<1x4x2x128xf32, #tpu.memory_space<vmem>>, vector<1x1x2x128xf32>
    %26 = vector.shape_cast %25 : vector<1x1x2x128xf32> to vector<2x128xf32>
    %c0_39 = arith.constant 0 : index
    %c5 = arith.constant 5 : index
    %c0_40 = arith.constant 0 : index
    %c0_41 = arith.constant 0 : index
    %27 = vector.load %arg4[%c0_39, %c5, %c0_40, %c0_41] : memref<1x7x2x128xf32, #tpu.memory_space<vmem>>, vector<1x1x2x128xf32>
    %28 = vector.shape_cast %27 : vector<1x1x2x128xf32> to vector<2x128xf32>
    %29 = vector.shape_cast %26 : vector<2x128xf32> to vector<1x1x2x128xf32>
    tpu.vector_store %arg4[%c0_39, %c5, %c0_40, %c0_41], %29 {strides = array<i32>} : memref<1x7x2x128xf32, #tpu.memory_space<vmem>>, vector<1x1x2x128xf32>,
    %c0_42 = arith.constant 0 : index
    %c3_43 = arith.constant 3 : index
    %c0_44 = arith.constant 0 : index
    %c0_45 = arith.constant 0 : index
    %30 = vector.load %arg3[%c0_42, %c3_43, %c0_44, %c0_45] : memref<1x4x2x128xf32, #tpu.memory_space<vmem>>, vector<1x1x2x128xf32>
    %31 = vector.shape_cast %30 : vector<1x1x2x128xf32> to vector<2x128xf32>
    %c0_46 = arith.constant 0 : index
    %c6 = arith.constant 6 : index
    %c0_47 = arith.constant 0 : index
    %c0_48 = arith.constant 0 : index
    %32 = vector.load %arg4[%c0_46, %c6, %c0_47, %c0_48] : memref<1x7x2x128xf32, #tpu.memory_space<vmem>>, vector<1x1x2x128xf32>
    %33 = vector.shape_cast %32 : vector<1x1x2x128xf32> to vector<2x128xf32>
    %34 = vector.shape_cast %31 : vector<2x128xf32> to vector<1x1x2x128xf32>
    tpu.vector_store %arg4[%c0_46, %c6, %c0_47, %c0_48], %34 {strides = array<i32>} : memref<1x7x2x128xf32, #tpu.memory_space<vmem>>, vector<1x1x2x128xf32>,
    return
  }
  func.func @transform_0(%arg0: i32, %arg1: i32) -> (i32, i32, i32, i32) {
    %c0_i32 = arith.constant 0 : i32
    %c0_i32_0 = arith.constant 0 : i32
    %c0_i32_1 = arith.constant 0 : i32
    return %arg0, %c0_i32, %arg1, %c0_i32_0 : i32, i32, i32, i32
  }
  func.func @transform_1(%arg0: i32, %arg1: i32) -> (i32, i32, i32, i32) {
    %c0_i32 = arith.constant 0 : i32
    %c0_i32_0 = arith.constant 0 : i32
    %c0_i32_1 = arith.constant 0 : i32
    return %arg0, %c0_i32, %arg1, %c0_i32_0 : i32, i32, i32, i32
  }
  func.func @transform_2(%arg0: i32, %arg1: i32) -> (i32, i32, i32, i32) {
    %c0_i32 = arith.constant 0 : i32
    %c0_i32_0 = arith.constant 0 : i32
    %c0_i32_1 = arith.constant 0 : i32
    return %arg0, %c0_i32, %arg1, %c0_i32_0 : i32, i32, i32, i32
  }
}

</mosaic_0001>

<bundles_post_ra>
// kernel: phi_scheme.1
= control target key start
LH: loop header
LB: loop body
LE: loop exit
PB: predicated region body
PF: predicated region fallthrough
CT: control target
= control target key end

     0   :  { %s420_s9 = smov 0   ;;  %s422_s10 = smov 0   ;;  %s444_s0 = inlined_call_operand.vmem [shape: f32[2,3,2,128], index: 0, kind: input, shape index: {}]   ;;  %s445_s1 = inlined_call_operand.vmem [shape: f32[2,4,2,128], index: 1, kind: input, shape index: {}]   ;;  %s446_s2 = inlined_call_operand.vmem [shape: f32[2,7,2,128], index: 2, kind: output, shape index: {}]  }
   0x1   :  { %s424_s11 = smov 0  }
   0x2 LB: > { %s24_s12 = sadd.s32 1, %s399_s10  ;;  %p336_p0 = scmp.ge.s32.totalorder %s403_s11, 1  ;;  %s403_s11 = sphi %s424_s11, %s12_s11   ;;  %s399_s10 = sphi %s422_s10, %s448_s10   ;;  %s395_s9 = sphi %s420_s9, %s447_s9  }
   0x3   : > { %p26_p1 = scmp.ge.s32.totalorder %s24_s12, 2  ;;  %p146_p2 = scmp.lt.s32.totalorder %s403_s11, 3 }
   0x5   : > { %s450_s12 = smov (%p26_p1, %s24_s12), 0  ;;  %p147_p3 = pnand %p336_p0, %p146_p2 }
   0x6   : > { %p182_p4 = scmp.lt.s32.totalorder (!%p147_p3), %s395_s9, 1 }
   0x7   : > { %150 = sbr.rel (%p147_p3) target bundleno = 20 (0x14), region = 28 }
   0xc   : > { %s452_s9 = smov (!%p182_p4, %s395_s9), 1 }
   0xd   : > { %s355_s13 = smul.u32 6, %s452_s9  ;;  %s354_s14 = sshll.u32 %s452_s9, 3 }
   0xe   : > { %s356_s15 = smul.u32 14, %s452_s9  ;;  %s197_s18 = scalar_lea.vmem %s445_s1, %s354_s14 }
   0xf   : > { %s189_s21 = scalar_lea.vmem %s444_s0, %s355_s13  ;;  %v216_v2 = vld [vmem:[%s197_s18] sm:$0xff]  }
  0x10   : > { %s205_s24 = scalar_lea.vmem %s446_s2, %s356_s15  ;;  %v206_v0 = vld [vmem:[%s189_s21] sm:$0xf]   ;;  %v343_v1 = vld [vmem:[%s189_s21 + $0x4] sm:$0x3] }
  0x11   : > { %207 = vst [vmem:[%s205_s24] sm:$0xf] %v206_v0  }
  0x12   : > { %344 = vst [vmem:[%s205_s24 + $0x4] sm:$0x3] %v343_v1 }
  0x13   : > { %345 = vst [vmem:[%s205_s24 + $0x6] sm:$0xff] %v216_v2  }
  0x14 PF: > { %s12_s11 = sadd.s32 1, %s403_s11   ;;  %s447_s9 = smov %s399_s10 }
  0x15   : > { %p9_p5 = scmp.ge.s32.totalorder %s12_s11, 4   ;;  %s448_s10 = smov %s450_s12 }
  0x17   :  { %11 = sbr.rel (!%p9_p5) target bundleno = 2 (0x2), region = 72 }

</bundles_post_ra>
